<compile_context>
chip_gen: v5e
topology: v5e:2x2
jax: 0.10.0
libtpu: 0.0.40
codegen_flags: <defaults>
</compile_context>

<pallas_src>
import jax
import jax.numpy as jnp
from jax.experimental import pallas as pl
from jax.experimental.pallas import tpu as pltpu


def _cdiv(a, b):
    return -(-a // b)


def _round_up(x, m):
    return _cdiv(x, m) * m


def _make_clinear_kernel(has_bias):
    def kernel(*refs):
        if has_bias:
            (xr_ref, xi_ref, wr_ref, wi_ref, br_ref, bi_ref,
             or_ref, oi_ref, acc1, acc2, acc3) = refs
        else:
            (xr_ref, xi_ref, wr_ref, wi_ref,
             or_ref, oi_ref, acc1, acc2, acc3) = refs
            br_ref = bi_ref = None

        k = pl.program_id(2)

        xr = xr_ref[...]
        xi = xi_ref[...]
        wr = wr_ref[...]
        wi = wi_ref[...]

        # Gauss / Karatsuba complex multiply: 3 MXU matmuls instead of 4.
        # The (tm,tk)/(tk,tn) VPU adds ride in idle VALU slots of the MXU-bound loop.
        t1 = jnp.dot(xr, wr, preferred_element_type=jnp.float32)
        t2 = jnp.dot(xi, wi, preferred_element_type=jnp.float32)
        t3 = jnp.dot(xr + xi, wr + wi, preferred_element_type=jnp.float32)

        @pl.when(k == 0)
        def _():
            # First K step writes the accumulators directly (no zero-fill + add pass).
            acc1[...] = t1
            acc2[...] = t2
            acc3[...] = t3

        @pl.when(k != 0)
        def _():
            acc1[...] += t1
            acc2[...] += t2
            acc3[...] += t3

        @pl.when(k == pl.num_programs(2) - 1)
        def _():
            re = acc1[...] - acc2[...]
            im = acc3[...] - acc1[...] - acc2[...]
            if has_bias:
                re = re + br_ref[...]          # (1,tn) broadcasts over sublanes
                im = im + bi_ref[...]
            or_ref[...] = re.astype(or_ref.dtype)
            oi_ref[...] = im.astype(oi_ref.dtype)

    return kernel


def _pick_tile(dim, pref, mult):
    """Balanced tile (multiple of `mult`) near `pref`, minimizing padding."""
    dp = _round_up(dim, mult)
    pref = max(mult, _round_up(min(pref, dp), mult))
    nblocks = _cdiv(dp, pref)
    tile = _round_up(_cdiv(dp, nblocks), mult)
    return tile, nblocks * tile


def _prep2d(a, rows, cols, dtype):
    """Cast + pad only when needed (skip HBM round-trips for aligned inputs)."""
    if a.dtype != dtype:
        a = a.astype(dtype)
    if a.shape != (rows, cols):
        a = jnp.pad(a, ((0, rows - a.shape[0]), (0, cols - a.shape[1])))
    return a


def clinear_forward(x_re, x_im, w_re, w_im, b_re=None, b_im=None, *,
                    tm=512, tn=512, tk=512,
                    compute_dtype=jnp.bfloat16, out_dtype=jnp.float32):
    """Complex linear layer: out = x @ W (+ b). Returns (out_re, out_im).

    compute_dtype: dtype fed to the MXU (default bf16 — ~2x MXU throughput and half
    the HBM read traffic; accumulation is always f32). Pass jnp.float32 if full
    matmul precision on f32 weights/activations is required.
    """
    M, K = x_re.shape
    K2, N = w_re.shape
    assert K == K2, "x / weight inner dims must match"

    has_bias = (b_re is not None) or (b_im is not None)
    if has_bias:
        if b_re is None:
            b_re = jnp.zeros((N,), jnp.float32)
        if b_im is None:
            b_im = jnp.zeros((N,), jnp.float32)

    # Tile selection: M padded to 8, N/K padded to 128; balanced blocks near the
    # preferred size so padding waste stays < one alignment unit per dim.
    tm, Mp = _pick_tile(M, tm, 8)
    tk, Kp = _pick_tile(K, tk, 128)
    tn, Np = _pick_tile(N, tn, 128)

    grid_m, grid_n, grid_k = Mp // tm, Np // tn, Kp // tk

    # v7x has 2 TensorCores sharded over the "parallel" axes; make sure at least one
    # parallel axis has >= 2 blocks when it can be done without extra padding.
    if grid_m == 1 and grid_n == 1 and Np >= 256 and Np % 256 == 0:
        tn = Np // 2
        grid_n = 2

    xr = _prep2d(x_re, Mp, Kp, compute_dtype)
    xi = _prep2d(x_im, Mp, Kp, compute_dtype)
    wr = _prep2d(w_re, Kp, Np, compute_dtype)
    wi = _prep2d(w_im, Kp, Np, compute_dtype)

    x_spec = pl.BlockSpec((tm, tk), lambda i, j, k: (i, k))
    w_spec = pl.BlockSpec((tk, tn), lambda i, j, k: (k, j))
    o_spec = pl.BlockSpec((tm, tn), lambda i, j, k: (i, j))

    operands = [xr, xi, wr, wi]
    in_specs = [x_spec, x_spec, w_spec, w_spec]
    if has_bias:
        br = _prep2d(b_re.reshape(1, N), 1, Np, jnp.float32)
        bi = _prep2d(b_im.reshape(1, N), 1, Np, jnp.float32)
        b_spec = pl.BlockSpec((1, tn), lambda i, j, k: (0, j))
        operands += [br, bi]
        in_specs += [b_spec, b_spec]

    # VMEM budget: double-buffered x/w planes + double-buffered output planes
    # + three f32 accumulators (+ bias tiles). Cap at 48 MiB -> safe on v7x (64 MiB
    # physical per TC) while leaving Mosaic internal-scratch headroom everywhere.
    in_bytes = jnp.dtype(compute_dtype).itemsize
    out_bytes = jnp.dtype(out_dtype).itemsize
    est = (2 * 2 * (tm * tk + tk * tn) * in_bytes
           + 2 * 2 * tm * tn * out_bytes
           + 3 * tm * tn * 4)
    if has_bias:
        est += 2 * 2 * tn * 4
    vmem_limit = int(min(48 * 2 ** 20, max(32 * 2 ** 20, 2 * est)))

    out_re, out_im = pl.pallas_call(
        _make_clinear_kernel(has_bias),
        out_shape=(jax.ShapeDtypeStruct((Mp, Np), out_dtype),
                   jax.ShapeDtypeStruct((Mp, Np), out_dtype)),
        grid_spec=pltpu.PrefetchScalarGridSpec(
            num_scalar_prefetch=0,
            grid=(grid_m, grid_n, grid_k),
            in_specs=in_specs,
            out_specs=(o_spec, o_spec),
            scratch_shapes=[pltpu.VMEM((tm, tn), jnp.float32),
                            pltpu.VMEM((tm, tn), jnp.float32),
                            pltpu.VMEM((tm, tn), jnp.float32)]),
        compiler_params=pltpu.CompilerParams(
            dimension_semantics=("parallel", "parallel", "arbitrary"),
            vmem_limit_bytes=vmem_limit),
    )(*operands)

    if (Mp, Np) != (M, N):
        out_re = out_re[:M, :N]
        out_im = out_im[:M, :N]
    return out_re, out_im


def init_clinear_params(key, in_features, out_features, enable_bias=True):
    """Deterministic synthetic init mimicking complex_xavier_uniform_ + zero bias."""
    k_re, k_im = jax.random.split(key)
    bound = (6.0 / (in_features + out_features)) ** 0.5
    w_re = jax.random.uniform(k_re, (in_features, out_features),
                              jnp.float32, -bound, bound)
    w_im = jax.random.uniform(k_im, (in_features, out_features),
                              jnp.float32, -bound, bound)
    if enable_bias:
        b_re = jnp.zeros((out_features,), jnp.float32)
        b_im = jnp.zeros((out_features,), jnp.float32)
    else:
        b_re = b_im = None
    return w_re, w_im, b_re, b_im


if __name__ == "__main__":
    key = jax.random.PRNGKey(0)
    k_xr, k_xi, k_w, k_br, k_bi = jax.random.split(key, 5)

    # Small shapes that still exercise multi-tile M/N, multi-step K and padding.
    M, in_features, out_features = 16, 320, 192

    x_re = jax.random.normal(k_xr, (M, in_features), jnp.float32)
    x_im = jax.random.normal(k_xi, (M, in_features), jnp.float32)
    w_re, w_im, b_re, b_im = init_clinear_params(k_w, in_features, out_features, True)
    # Non-zero bias in the demo so the bias-add path is actually checked
    # (module init is zeros; forward semantics unchanged).
    b_re = 0.1 * jax.random.normal(k_br, (out_features,), jnp.float32)
    b_im = 0.1 * jax.random.normal(k_bi, (out_features,), jnp.float32)

    # Reference with native complex arithmetic (host-side check only).
    ref_nb = (x_re + 1j * x_im) @ (w_re + 1j * w_im)
    ref = ref_nb + (b_re + 1j * b_im)

    # --- Run 1: f32 MXU operands, small explicit tiles (2x2x3 grid), with bias. ---
    o_re, o_im = clinear_forward(x_re, x_im, w_re, w_im, b_re, b_im,
                                 tm=8, tn=128, tk=128,
                                 compute_dtype=jnp.float32)
    o_re = jax.block_until_ready(o_re)
    o_im = jax.block_until_ready(o_im)
    assert jnp.allclose(o_re, ref.real, atol=5e-4, rtol=5e-4)
    assert jnp.allclose(o_im, ref.imag, atol=5e-4, rtol=5e-4)

    # --- Run 2: default bf16 MXU path, default (large) tiles, no bias. ---
    o_re2, o_im2 = clinear_forward(x_re, x_im, w_re, w_im, None, None)
    o_re2 = jax.block_until_ready(o_re2)
    o_im2 = jax.block_until_ready(o_im2)
    err = jnp.sqrt(jnp.sum((o_re2 - ref_nb.real) ** 2 + (o_im2 - ref_nb.imag) ** 2))
    scale = jnp.sqrt(jnp.sum(ref_nb.real ** 2 + ref_nb.imag ** 2))
    assert float(err / scale) < 0.03, float(err / scale)

    print("KERNEL_OK")
</pallas_src>

<mosaic_0001>
module attributes {stable_mosaic.version = 11 : i64} {
  func.func @kernel(%arg0: i32, %arg1: i32, %arg2: i32, %arg3: memref<8x128xf32, #tpu.memory_space<vmem>>, %arg4: memref<8x128xf32, #tpu.memory_space<vmem>>, %arg5: memref<128x128xf32, #tpu.memory_space<vmem>>, %arg6: memref<128x128xf32, #tpu.memory_space<vmem>>, %arg7: memref<1x128xf32, #tpu.memory_space<vmem>>, %arg8: memref<1x128xf32, #tpu.memory_space<vmem>>, %arg9: memref<8x128xf32, #tpu.memory_space<vmem>>, %arg10: memref<8x128xf32, #tpu.memory_space<vmem>>, %arg11: memref<8x128xf32, #tpu.memory_space<vmem>>, %arg12: memref<8x128xf32, #tpu.memory_space<vmem>>, %arg13: memref<8x128xf32, #tpu.memory_space<vmem>>) attributes {dimension_semantics = [#tpu.dimension_semantics<parallel>, #tpu.dimension_semantics<parallel>, #tpu.dimension_semantics<arbitrary>], iteration_bounds = array<i64: 2, 2, 3>, scalar_prefetch = 0 : i64, scratch_operands = 3 : i64, tpu.core_type = #tpu.core_type<tc>, window_params = [{transform_indices = @transform_0, window_bounds = array<i64: 8, 128>}, {transform_indices = @transform_1, window_bounds = array<i64: 8, 128>}, {transform_indices = @transform_2, window_bounds = array<i64: 128, 128>}, {transform_indices = @transform_3, window_bounds = array<i64: 128, 128>}, {transform_indices = @transform_4, window_bounds = array<i64: 1, 128>}, {transform_indices = @transform_5, window_bounds = array<i64: 1, 128>}, {transform_indices = @transform_6, window_bounds = array<i64: 8, 128>}, {transform_indices = @transform_7, window_bounds = array<i64: 8, 128>}]} {
    %c0 = arith.constant 0 : index
    %c0_0 = arith.constant 0 : index
    %0 = vector.load %arg3[%c0, %c0_0] : memref<8x128xf32, #tpu.memory_space<vmem>>, vector<8x128xf32>
    %c0_1 = arith.constant 0 : index
    %c0_2 = arith.constant 0 : index
    %1 = vector.load %arg4[%c0_1, %c0_2] : memref<8x128xf32, #tpu.memory_space<vmem>>, vector<8x128xf32>
    %c0_3 = arith.constant 0 : index
    %c0_4 = arith.constant 0 : index
    %2 = vector.load %arg5[%c0_3, %c0_4] : memref<128x128xf32, #tpu.memory_space<vmem>>, vector<128x128xf32>
    %c0_5 = arith.constant 0 : index
    %c0_6 = arith.constant 0 : index
    %3 = vector.load %arg6[%c0_5, %c0_6] : memref<128x128xf32, #tpu.memory_space<vmem>>, vector<128x128xf32>
    %cst = arith.constant dense<0.000000e+00> : vector<8x128xf32>
    %4 = tpu.matmul %0, %2, %cst {dimension_numbers = #tpu.dot_dimension_numbers<[1], [0], [0], [1], [0, 0, 1, 1], [], []>} : vector<8x128xf32>, vector<128x128xf32>, vector<8x128xf32> -> vector<8x128xf32>
    %cst_7 = arith.constant dense<0.000000e+00> : vector<8x128xf32>
    %5 = tpu.matmul %1, %3, %cst_7 {dimension_numbers = #tpu.dot_dimension_numbers<[1], [0], [0], [1], [0, 0, 1, 1], [], []>} : vector<8x128xf32>, vector<128x128xf32>, vector<8x128xf32> -> vector<8x128xf32>
    %6 = arith.addf %0, %1 : vector<8x128xf32>
    %7 = arith.addf %2, %3 : vector<128x128xf32>
    %cst_8 = arith.constant dense<0.000000e+00> : vector<8x128xf32>
    %8 = tpu.matmul %6, %7, %cst_8 {dimension_numbers = #tpu.dot_dimension_numbers<[1], [0], [0], [1], [0, 0, 1, 1], [], []>} : vector<8x128xf32>, vector<128x128xf32>, vector<8x128xf32> -> vector<8x128xf32>
    %c0_i32 = arith.constant 0 : i32
    %9 = arith.cmpi eq, %arg2, %c0_i32 : i32
    %10 = arith.extui %9 : i1 to i32
    %c0_i32_9 = arith.constant 0 : i32
    %11 = arith.cmpi ne, %10, %c0_i32_9 : i32
    scf.if %11 {
      %c0_13 = arith.constant 0 : index
      %c0_14 = arith.constant 0 : index
      %18 = vector.load %arg11[%c0_13, %c0_14] : memref<8x128xf32, #tpu.memory_space<vmem>>, vector<8x128xf32>
      tpu.vector_store %arg11[%c0_13, %c0_14], %4 {strides = array<i32>} : memref<8x128xf32, #tpu.memory_space<vmem>>, vector<8x128xf32>,
      %c0_15 = arith.constant 0 : index
      %c0_16 = arith.constant 0 : index
      %19 = vector.load %arg12[%c0_15, %c0_16] : memref<8x128xf32, #tpu.memory_space<vmem>>, vector<8x128xf32>
      tpu.vector_store %arg12[%c0_15, %c0_16], %5 {strides = array<i32>} : memref<8x128xf32, #tpu.memory_space<vmem>>, vector<8x128xf32>,
      %c0_17 = arith.constant 0 : index
      %c0_18 = arith.constant 0 : index
      %20 = vector.load %arg13[%c0_17, %c0_18] : memref<8x128xf32, #tpu.memory_space<vmem>>, vector<8x128xf32>
      tpu.vector_store %arg13[%c0_17, %c0_18], %8 {strides = array<i32>} : memref<8x128xf32, #tpu.memory_space<vmem>>, vector<8x128xf32>,
    } else {
    }
    %c0_i32_10 = arith.constant 0 : i32
    %12 = arith.cmpi ne, %arg2, %c0_i32_10 : i32
    %13 = arith.extui %12 : i1 to i32
    %c0_i32_11 = arith.constant 0 : i32
    %14 = arith.cmpi ne, %13, %c0_i32_11 : i32
    scf.if %14 {
      %c0_13 = arith.constant 0 : index
      %c0_14 = arith.constant 0 : index
      %18 = vector.load %arg11[%c0_13, %c0_14] : memref<8x128xf32, #tpu.memory_space<vmem>>, vector<8x128xf32>
      %19 = arith.addf %18, %4 : vector<8x128xf32>
      %c0_15 = arith.constant 0 : index
      %c0_16 = arith.constant 0 : index
      %20 = vector.load %arg11[%c0_15, %c0_16] : memref<8x128xf32, #tpu.memory_space<vmem>>, vector<8x128xf32>
      tpu.vector_store %arg11[%c0_15, %c0_16], %19 {strides = array<i32>} : memref<8x128xf32, #tpu.memory_space<vmem>>, vector<8x128xf32>,
      %c0_17 = arith.constant 0 : index
      %c0_18 = arith.constant 0 : index
      %21 = vector.load %arg12[%c0_17, %c0_18] : memref<8x128xf32, #tpu.memory_space<vmem>>, vector<8x128xf32>
      %22 = arith.addf %21, %5 : vector<8x128xf32>
      %c0_19 = arith.constant 0 : index
      %c0_20 = arith.constant 0 : index
      %23 = vector.load %arg12[%c0_19, %c0_20] : memref<8x128xf32, #tpu.memory_space<vmem>>, vector<8x128xf32>
      tpu.vector_store %arg12[%c0_19, %c0_20], %22 {strides = array<i32>} : memref<8x128xf32, #tpu.memory_space<vmem>>, vector<8x128xf32>,
      %c0_21 = arith.constant 0 : index
      %c0_22 = arith.constant 0 : index
      %24 = vector.load %arg13[%c0_21, %c0_22] : memref<8x128xf32, #tpu.memory_space<vmem>>, vector<8x128xf32>
      %25 = arith.addf %24, %8 : vector<8x128xf32>
      %c0_23 = arith.constant 0 : index
      %c0_24 = arith.constant 0 : index
      %26 = vector.load %arg13[%c0_23, %c0_24] : memref<8x128xf32, #tpu.memory_space<vmem>>, vector<8x128xf32>
      tpu.vector_store %arg13[%c0_23, %c0_24], %25 {strides = array<i32>} : memref<8x128xf32, #tpu.memory_space<vmem>>, vector<8x128xf32>,
    } else {
    }
    %c2_i32 = arith.constant 2 : i32
    %15 = arith.cmpi eq, %arg2, %c2_i32 : i32
    %16 = arith.extui %15 : i1 to i32
    %c0_i32_12 = arith.constant 0 : i32
    %17 = arith.cmpi ne, %16, %c0_i32_12 : i32
    scf.if %17 {
      %c0_13 = arith.constant 0 : index
      %c0_14 = arith.constant 0 : index
      %18 = vector.load %arg11[%c0_13, %c0_14] : memref<8x128xf32, #tpu.memory_space<vmem>>, vector<8x128xf32>
      %c0_15 = arith.constant 0 : index
      %c0_16 = arith.constant 0 : index
      %19 = vector.load %arg12[%c0_15, %c0_16] : memref<8x128xf32, #tpu.memory_space<vmem>>, vector<8x128xf32>
      %20 = arith.subf %18, %19 : vector<8x128xf32>
      %c0_17 = arith.constant 0 : index
      %c0_18 = arith.constant 0 : index
      %21 = vector.load %arg13[%c0_17, %c0_18] : memref<8x128xf32, #tpu.memory_space<vmem>>, vector<8x128xf32>
      %c0_19 = arith.constant 0 : index
      %c0_20 = arith.constant 0 : index
      %22 = vector.load %arg11[%c0_19, %c0_20] : memref<8x128xf32, #tpu.memory_space<vmem>>, vector<8x128xf32>
      %23 = arith.subf %21, %22 : vector<8x128xf32>
      %c0_21 = arith.constant 0 : index
      %c0_22 = arith.constant 0 : index
      %24 = vector.load %arg12[%c0_21, %c0_22] : memref<8x128xf32, #tpu.memory_space<vmem>>, vector<8x128xf32>
      %25 = arith.subf %23, %24 : vector<8x128xf32>
      %c0_23 = arith.constant 0 : index
      %c0_24 = arith.constant 0 : index
      %26 = vector.load %arg7[%c0_23, %c0_24] : memref<1x128xf32, #tpu.memory_space<vmem>>, vector<1x128xf32>
      %27 = vector.broadcast %26 : vector<1x128xf32> to vector<8x128xf32>
      %28 = arith.addf %20, %27 : vector<8x128xf32>
      %c0_25 = arith.constant 0 : index
      %c0_26 = arith.constant 0 : index
      %29 = vector.load %arg8[%c0_25, %c0_26] : memref<1x128xf32, #tpu.memory_space<vmem>>, vector<1x128xf32>
      %30 = vector.broadcast %29 : vector<1x128xf32> to vector<8x128xf32>
      %31 = arith.addf %25, %30 : vector<8x128xf32>
      %c0_27 = arith.constant 0 : index
      %c0_28 = arith.constant 0 : index
      %32 = vector.load %arg9[%c0_27, %c0_28] : memref<8x128xf32, #tpu.memory_space<vmem>>, vector<8x128xf32>
      tpu.vector_store %arg9[%c0_27, %c0_28], %28 {strides = array<i32>} : memref<8x128xf32, #tpu.memory_space<vmem>>, vector<8x128xf32>,
      %c0_29 = arith.constant 0 : index
      %c0_30 = arith.constant 0 : index
      %33 = vector.load %arg10[%c0_29, %c0_30] : memref<8x128xf32, #tpu.memory_space<vmem>>, vector<8x128xf32>
      tpu.vector_store %arg10[%c0_29, %c0_30], %31 {strides = array<i32>} : memref<8x128xf32, #tpu.memory_space<vmem>>, vector<8x128xf32>,
    } else {
    }
    return
  }
  func.func @transform_0(%arg0: i32, %arg1: i32, %arg2: i32) -> (i32, i32) {
    %c0_i32 = arith.constant 0 : i32
    return %arg0, %arg2 : i32, i32
  }
  func.func @transform_1(%arg0: i32, %arg1: i32, %arg2: i32) -> (i32, i32) {
    %c0_i32 = arith.constant 0 : i32
    return %arg0, %arg2 : i32, i32
  }
  func.func @transform_2(%arg0: i32, %arg1: i32, %arg2: i32) -> (i32, i32) {
    %c0_i32 = arith.constant 0 : i32
    return %arg2, %arg1 : i32, i32
  }
  func.func @transform_3(%arg0: i32, %arg1: i32, %arg2: i32) -> (i32, i32) {
    %c0_i32 = arith.constant 0 : i32
    return %arg2, %arg1 : i32, i32
  }
  func.func @transform_4(%arg0: i32, %arg1: i32, %arg2: i32) -> (i32, i32) {
    %c0_i32 = arith.constant 0 : i32
    %c0_i32_0 = arith.constant 0 : i32
    return %c0_i32, %arg1 : i32, i32
  }
  func.func @transform_5(%arg0: i32, %arg1: i32, %arg2: i32) -> (i32, i32) {
    %c0_i32 = arith.constant 0 : i32
    %c0_i32_0 = arith.constant 0 : i32
    return %c0_i32, %arg1 : i32, i32
  }
  func.func @transform_6(%arg0: i32, %arg1: i32, %arg2: i32) -> (i32, i32) {
    %c0_i32 = arith.constant 0 : i32
    return %arg0, %arg1 : i32, i32
  }
  func.func @transform_7(%arg0: i32, %arg1: i32, %arg2: i32) -> (i32, i32) {
    %c0_i32 = arith.constant 0 : i32
    return %arg0, %arg1 : i32, i32
  }
}

</mosaic_0001>

<bundles_post_ra>
// kernel: tpu_custom_call.1
= control target key start
LH: loop header
LB: loop body
LE: loop exit
PB: predicated region body
PF: predicated region fallthrough
CT: control target
= control target key end

     0   :  { %s1894_s0 = inlined_call_operand.hbm [shape: f32[16,384], index: 0, kind: input, shape index: {}]   ;;  %s1895_s1 = inlined_call_operand.hbm [shape: f32[16,384], index: 1, kind: input, shape index: {}]   ;;  %s1896_s2 = inlined_call_operand.hbm [shape: f32[384,256], index: 2, kind: input, shape index: {}]   ;;  %s1897_s3 = inlined_call_operand.hbm [shape: f32[384,256], index: 3, kind: input, shape index: {}]   ;;  %s1898_s4 = inlined_call_operand.vmem [shape: f32[1,256], index: 4, kind: input, shape index: {}]   ;;  %s1899_s5 = inlined_call_operand.vmem [shape: f32[1,256], index: 5, kind: input, shape index: {}]   ;;  %s1900_s6 = inlined_call_operand.hbm [shape: f32[16,256], index: 6, kind: output, shape index: {0}]   ;;  %s1901_s7 = inlined_call_operand.hbm [shape: f32[16,256], index: 7, kind: output, shape index: {1}]  }
   0x1   :  { %1919 = sst [smem:[#allocation39_spill]] %s1894_s0 }
   0x2   :  { %1920 = sst [smem:[#allocation40_spill]] %s1895_s1 }
   0x3   :  { %1921 = sst [smem:[#allocation41_spill]] %s1896_s2 }
   0x4   :  { %1922 = sst [smem:[#allocation42_spill]] %s1898_s4 }
   0x5   :  { %1923 = sst [smem:[#allocation43_spill]] %s1899_s5 }
   0x6   :  { %1924 = sst [smem:[#allocation44_spill]] %s1900_s6 }
   0x7   :  { %1925 = sst [smem:[#allocation45_spill]] %s1901_s7 }
   0x8   :  { %13 = vsyncpa [#allocation6], 0 }
   0x9   :  { %15 = vsyncpa [#allocation6 + $0x1], 0 }
   0xa   :  { %16 = vsyncpa [#allocation9], 0 }
   0xb   :  { %18 = vsyncpa [#allocation9 + $0x1], 0 }
   0xc   :  { %19 = vsyncpa [#allocation12], 0 }
   0xd   :  { %21 = vsyncpa [#allocation12 + $0x1], 0 }
   0xe   :  { %22 = vsyncpa [#allocation7], 0 }
   0xf   :  { %24 = vsyncpa [#allocation7 + $0x1], 0 }
  0x10   :  { %25 = vsyncpa [#allocation15], 0 }
  0x11   :  { %27 = vsyncpa [#allocation15 + $0x1], 0  ;;  %s1480_s24 = smov 0   ;;  %s1482_s25 = smov 0  }
  0x12   :  { %s1484_s26 = smov 0   ;;  %s1486_s27 = smov 0  }
  0x13   :  { %s1488_s28 = smov 0   ;;  %s1490_s29 = smov 0  }
  0x14   :  { %s1492_s30 = smov 0   ;;  %s1494_s8 = smov 0  }
  0x15   :  { %s1496_s9 = smov 0   ;;  %s1498_s10 = smov 0  }
  0x16   :  { %s1500_s11 = smov 0   ;;  %s1502_s12 = smov 0  }
  0x17   :  { %s1504_s13 = smov 0   ;;  %s1506_s14 = smov 0  }
  0x18   :  { %s1508_s15 = smov 0   ;;  %s1510_s16 = smov 0  }
  0x19 LB: > { %1926 = sst [smem:[#allocation22_spill]] %s1375_s24  ;;  %s1559_s17 = sadd.s32 4294967295, %s1435_s16   ;;  %s1435_s16 = sphi %s1510_s16, %s33_s16   ;;  %s1431_s15 = sphi %s1508_s15, %s1984_s15   ;;  %s1427_s14 = sphi %s1506_s14, %s1983_s14   ;;  %s1423_s13 = sphi %s1504_s13, %s1982_s13   ;;  %s1419_s12 = sphi %s1502_s12, %s1981_s12   ;;  %s1415_s11 = sphi %s1500_s11, %s1980_s11   ;;  %s1411_s10 = sphi %s1498_s10, %s1979_s10   ;;  %s1407_s9 = sphi %s1496_s9, %s1993_s9   ;;  %s1403_s8 = sphi %s1494_s8, %s1992_s8   ;;  %s1399_s30 = sphi %s1492_s30, %s1991_s30   ;;  %s1395_s29 = sphi %s1490_s29, %s1990_s29   ;;  %s1391_s28 = sphi %s1488_s28, %s1989_s28   ;;  %s1387_s27 = sphi %s1486_s27, %s1988_s27   ;;  %s1383_s26 = sphi %s1484_s26, %s1976_s26   ;;  %s1379_s25 = sphi %s1482_s25, %s1987_s25   ;;  %s1375_s24 = sphi %s1480_s24, %s1985_s24  }
  0x1a   : > { %1927 = sst [smem:[#allocation23_spill]] %s1383_s26  ;;  %s45_s19 = sadd.s32 1, %s1423_s13 }
  0x1b   : > { %1928 = sst [smem:[#allocation24_spill]] %s1411_s10  ;;  %s48_s20 = sadd.s32 1, %s1427_s14 }
  0x1c   : > { %1929 = sst [smem:[#allocation25_spill]] %s1415_s11  ;;  %p46_p0 = scmp.ge.s32.totalorder %s45_s19, 3 }
  0x1d   : > { %1930 = sst [smem:[#allocation26_spill]] %s1419_s12  ;;  %s52_s21 = sadd.s32 1, %s1431_s15 }
  0x1e   : > { %1931 = sst [smem:[#allocation27_spill]] %s1423_s13  ;;  %s61_s22 = sadd.s32 1, %s1407_s9 }
  0x1f   : > { %1932 = sst [smem:[#allocation28_spill]] %s1427_s14  ;;  %p68_p1 = scmp.ne.s32.totalorder %s1407_s9, %s1403_s8 }
  0x20   : > { %1933 = sst [smem:[#allocation29_spill]] %s1431_s15  ;;  %s1995_s19 = smov (%p46_p0, %s45_s19), 0 }
  0x21   : > { %1934 = sst [smem:[#allocation30_spill]] %s1435_s16  ;;  %s1997_s20 = smov (!%p46_p0, %s48_s20), %s1427_s14 }
  0x22   : > { %1935 = sst [smem:[#allocation31_spill]] %s1995_s19  ;;  %s57_s23 = ssub.s32 %s1423_s13, %s1995_s19 }
  0x23   : > { %p69_p2 = scmp.eq.s32.totalorder %s1435_s16, 0  ;;  %p50_p3 = scmp.ge.s32.totalorder %s1997_s20, 2 }
  0x24   : > { %p74_p4 = scmp.ne.s32.totalorder %s1403_s8, %s1399_s30  ;;  %p75_p6 = scmp.eq.s32.totalorder %s1559_s17, 0 }
  0x25   : > { %p1577_p5 = por %p69_p2, %p68_p1  ;;  %s1999_s20 = smov (%p50_p3, %s1997_s20), 0 }
  0x26   : > { %1937 = sst [smem:[#allocation32_spill]] %s1999_s20  ;;  %s2001_s21 = smov (!%p50_p3, %s52_s21), %s1431_s15 }
  0x27   : > { %p1587_p7 = por %p75_p6, %p74_p4  ;;  %s113_s30 = ssub.s32 %s1427_s14, %s1999_s20 }
  0x28   : > { %p54_p8 = scmp.ge.s32.totalorder %s2001_s21, 2  ;;  %s114_s7 = sor.u32 %s113_s30, %s57_s23 }
  0x29   : > { %p115_p9 = scmp.eq.s32.totalorder %s114_s7, 0  ;;  %s117_s6 = sadd.s32 1, %s1395_s29 }
  0x2a   : > { %s2003_s21 = smov (%p54_p8, %s2001_s21), 0  ;;  %p124_p10 = scmp.ne.s32.totalorder %s1395_s29, %s1391_s28 }
  0x2b   : > { %1939 = sst [smem:[#allocation33_spill]] %s2003_s21  ;;  %s56_s10 = ssub.s32 %s1431_s15, %s2003_s21 }
  0x2c   : > { %s1597_s12 = scalar_select %p115_p9, %s1395_s29, %s117_s6  }
  0x2d   : > { %s58_s20 = sor.u32 %s57_s23, %s56_s10  ;;  %p130_p11 = scmp.ne.s32.totalorder %s1391_s28, %s1387_s27 }
  0x2e   : > { %1940 = sst [smem:[#allocation34_spill]] %s1597_s12  ;;  %p59_p12 = scmp.eq.s32.totalorder %s58_s20, 0 }
  0x2f   : > { %p1607_p13 = por %p124_p10, %p69_p2  ;;  %p1613_p0 = por %p130_p11, %p75_p6 }
  0x30   : > { %s222_s21 = sor.u32 %s113_s30, %s56_s10  ;;  %s225_s27 = sadd.s32 1, %s1383_s26 }
  0x31   : > { %s1618_s23 = scalar_select %p59_p12, %s1407_s9, %s61_s22  }
  0x32   : > { %p223_p1 = scmp.eq.s32.totalorder %s222_s21, 0  ;;  %p235_p3 = scmp.ne.s32.totalorder %s1383_s26, %s1379_s25 }
  0x33   : > { %1943 = sst [smem:[#allocation35_spill]] %s1618_s23  ;;  %p236_p2 = scmp.eq.s32.totalorder %s1559_s17, 11 }
  0x34   : > { %s1625_s20 = scalar_select %p223_p1, %s1383_s26, %s225_s27  }
  0x35   : > { %p1627_p4 = por %p236_p2, %p235_p3  ;;  %p241_p6 = scmp.ne.s32.totalorder %s1379_s25, %s1375_s24 }
  0x36   : > { %1944 = sst [smem:[#allocation36_spill]] %s1625_s20  ;;  %s1947_s5 = sadd.s32 4294967294, %s1435_s16  }
  0x37   : > { %s1945_s12 = scalar_select %p1627_p4, 1, 0 }
  0x38   : > { %p242_p8 = scmp.eq.s32.totalorder %s1947_s5, 11  ;;  %p974_p9 = scmp.lt.s32.totalorder %s1435_s16, 12 }
  0x39   : > { %1946 = sst [smem:[#allocation37_spill]] %s1945_s12  ;;  %s1910_s10 = sand.u32 1, %s1407_s9  }
  0x3a   : > { %p1637_p10 = por %p242_p8, %p241_p6  ;;  %s908_s21 = sshll.u32 %s1910_s10, 3 }
  0x3b   : > { %s940_s30 = smul.u32 3, %s1431_s15  ;;  %p1648_p11 = pnand %p974_p9, %p1577_p5 }
  0x3c   : > { %s1948_s22 = scalar_select %p1637_p10, 1, 0 }
  0x3d   : > { %s311_s5 = sand.u32 1, %s1435_s16   ;;  %s298_s23 = sadd.s32 %s1423_s13, %s940_s30 }
  0x3e   : > { %1949 = sst [smem:[#allocation38_spill]] %s1948_s22  ;;  %s909_s20 = sshll.u32 %s298_s23, 3 }
  0x3f   : > { %s1951_s1 = sld [smem:[#allocation40_spill]]  ;;  %s315_s10 = scalar_lea.vmem [#allocation8], %s908_s21 }
  0x40   : > { %s325_s12 = sshll.u32 %s315_s10, 4  ;;  %s938_s18 = sshll.u32 %s1423_s13, 5  ;;  %s326_s12 = int_to_ptr.vmem [resolvable:$true] %s325_s12 }
  0x41   : > { %s1658_s15 = scalar_lea.sflag [#allocation9], %s311_s5  ;;  %s1664_s30 = sadd.s32 %s1427_s14, %s938_s18 }
  0x42   : > { %p1670_p5 = pnand %p974_p9, %p1607_p13  ;;  %p920_p12 = scmp.ge.s32.totalorder %s1435_s16, 1 }
  0x43   : > { %s1953_s2 = sld [smem:[#allocation41_spill]]  ;;  %p390_p1 = scmp.lt.s32.totalorder %s1435_s16, 13 }
  0x44   : > { %s1955_s0 = sld [smem:[#allocation39_spill]]  ;;  %s294_s18 = scalar_lea.vmem [#allocation5], %s908_s21 }
  0x45   : > { %s321_s24 = scalar_lea.hbm %s1951_s1, %s909_s20  ;;  %p1680_p3 = pnand %p920_p12, %p390_p1 }
  0x46   : > { %s323_s4 = sshll.u32 %s321_s24, 4  ;;  %s915_s24 = sshll.u32 %s1664_s30, 3  ;;  %s324_s4 = int_to_ptr.hbm [resolvable:$true] %s323_s4 }
  0x47   : > { %960 = dma.hbm_to_vmem [thread:$0]  (!%p1648_p11), %s324_s4, 128, %s326_s12, %s1658_s15  }
  0x48   : > { %s304_s1 = sshll.u32 %s294_s18, 4  ;;  %s334_s30 = sand.u32 1, %s1395_s29   ;;  %s305_s1 = int_to_ptr.vmem [resolvable:$true] %s304_s1 }
  0x49   : > { %s343_s22 = scalar_lea.hbm %s1953_s2, %s915_s24  ;;  %s1956_s13 = sand.u32 1, %s1407_s9  }
  0x4a   : > { %s300_s7 = scalar_lea.hbm %s1955_s0, %s909_s20  ;;  %s291_s23 = scalar_lea.sflag [#allocation6], %s1956_s13 }
  0x4b   : > { %s302_s14 = sshll.u32 %s300_s7, 4  ;;  %s912_s10 = sshll.u32 %s334_s30, 7  ;;  %s303_s14 = int_to_ptr.hbm [resolvable:$true] %s302_s14 }
  0x4c   : > { %957 = dma.hbm_to_vmem [thread:$0]  (!%p1648_p11), %s303_s14, 128, %s305_s1, %s291_s23  }
  0x4d   : > { %s344_s2 = sshll.u32 %s343_s22, 4  ;;  %s336_s16 = scalar_lea.vmem [#allocation10], %s912_s10  ;;  %s345_s2 = int_to_ptr.hbm [resolvable:$true] %s344_s2 }
  0x4e   : > { %s346_s11 = sshll.u32 %s336_s16, 4  ;;  %s1437_s20 = smov 256   ;;  %s347_s11 = int_to_ptr.vmem [resolvable:$true] %s346_s11 }
  0x4f   : > { %s1438_s21 = smov 128   ;;  %s1439_s4 = smov 8  }
  0x50   : > { %963 = dma.hbm_to_vmem [thread:$0]  (!%p1670_p5), %s345_s2, 2048, %s347_s11, %s1658_s15, %s1437_s20, %s1438_s21, %s1439_s4  }
  0x51   : > { %s367_s18 = scalar_lea.hbm %s1897_s3, %s915_s24  ;;  %s360_s13 = scalar_lea.vmem [#allocation11], %s912_s10 }
  0x52   : > { %s368_s0 = sshll.u32 %s367_s18, 4  ;;  %s370_s27 = sshll.u32 %s360_s13, 4  ;;  %s369_s0 = int_to_ptr.hbm [resolvable:$true] %s368_s0  ;;  %s371_s27 = int_to_ptr.vmem [resolvable:$true] %s370_s27 }
  0x53   : > { %s357_s1 = scalar_lea.sflag [#allocation12], %s334_s30  ;;  %394 = sbr.rel (%p1680_p3) target bundleno = 344 (0x158), region = 44 }
  0x54   : > { %966 = dma.hbm_to_vmem [thread:$0]  (!%p1670_p5), %s369_s0, 2048, %s371_s27, %s357_s1, %s1437_s20, %s1438_s21, %s1439_s4  }
  0x55   : > { %s396_s14 = sand.u32 (!%p1680_p3), 1, %s1403_s8  }
  0x56   : > { %s1703_s16 = sshll.u32 (!%p1680_p3), %s396_s14, 3  ;;  %s397_s2 = scalar_lea.sflag (!%p1680_p3), [#allocation6], %s396_s14 }
  0x57   : > { %s400_s11 = scalar_lea.vmem (!%p1680_p3), [#allocation5], %s1703_s16 }
  0x58   : > { %1350 = dma.done.wait (%p1587_p7), %s397_s2, 128  }
  0x59   : > { %1352 = vsyncadd (%p1587_p7), %s397_s2, 4294967168  ;;  %s406_s0 = sand.u32 1, %s1559_s17   ;;  %s410_s26 = scalar_lea.vmem [#allocation8], %s1703_s16 }
  0x5a   : > { %s407_s15 = scalar_lea.sflag [#allocation9], %s406_s0 }
  0x5b   : > { %1354 = dma.done.wait (%p1587_p7), %s407_s15, 128  }
  0x5c   : > { %1356 = vsyncadd (%p1587_p7), %s407_s15, 4294967168  ;;  %s418_s24 = sand.u32 1, %s1391_s28  }
  0x5d   : > { %s923_s22 = sshll.u32 %s418_s24, 7 }
  0x5e   : > { %s1717_s5 = scalar_lea.vmem [#allocation10], %s923_s22 }
  0x5f   : > { %1358 = dma.done.wait (%p1613_p0), %s407_s15, 2048  }
  0x60   : > { %1360 = vsyncadd (%p1613_p0), %s407_s15, 4294965248  ;;  %s427_s17 = scalar_lea.sflag [#allocation12], %s418_s24  ;;  %s1723_s30 = scalar_lea.vmem [#allocation11], %s923_s22 }
  0x61   : > { %1362 = dma.done.wait (%p1613_p0), %s427_s17, 2048  }
  0x62   : > { %1364 = vsyncadd (%p1613_p0), %s427_s17, 4294965248  ;;  %s1957_s19 = sld [smem:[#allocation25_spill]]  ;;  %s1730_s23 = sand.u32 1, %s1379_s25   ;;  %v513_v0 = vld [vmem:[%s1717_s5 + $0x78] sm:$0xff]  ;;  %v512_v2 = vld [vmem:[%s1717_s5 + $0x70] sm:$0xff] }
  0x63   : > { %s925_s10 = sshll.u32 %s1730_s23, 3  ;;  %s1958_s21 = sld [smem:[#allocation42_spill]]  ;;  %v529_v1 = vld [vmem:[%s1723_s30 + $0x78] sm:$0xff]  ;;  %v528_v4 = vld [vmem:[%s1723_s30 + $0x70] sm:$0xff]  ;;  %v511_v5 = vld [vmem:[%s1717_s5 + $0x68] sm:$0xff]  ;;  %530 = vmatpush.msra.mxu0 %v513_v0 }
  0x64   : > { %s1959_s18 = sld [smem:[#allocation43_spill]]  ;;  %v586_v3 = vadd.f32 %v529_v1, %v513_v0  ;;  %v527_v6 = vld [vmem:[%s1723_s30 + $0x68] sm:$0xff]  ;;  %550 = vmatpush.msra.mxu1 %v529_v1  ;;  %v585_v7 = vadd.f32 %v528_v4, %v512_v2  ;;  %v510_v8 = vld [vmem:[%s1717_s5 + $0x60] sm:$0xff]  ;;  %v509_v11 = vld [vmem:[%s1717_s5 + $0x58] sm:$0xff]  ;;  %s1783_s27 = scalar_lea.vmem [#allocation13], %s925_s10 }
  0x65   : > { %v526_v9 = vld [vmem:[%s1723_s30 + $0x60] sm:$0xff]  ;;  %v584_v10 = vadd.f32 %v527_v6, %v511_v5  ;;  %531 = vmatpush.msra.mxu0 %v512_v2  ;;  %v525_v12 = vld [vmem:[%s1723_s30 + $0x58] sm:$0xff]  ;;  %v508_v14 = vld [vmem:[%s1717_s5 + $0x50] sm:$0xff]  ;;  %s1787_s1 = scalar_lea.vmem [#allocation14], %s925_s10  ;;  %s1960_s14 = sld [smem:[#allocation24_spill]] }
  0x66   : > { %587 = vmatpush.msra.mxu2 %v586_v3  ;;  %551 = vmatpush.msra.mxu1 %v528_v4  ;;  %v583_v13 = vadd.f32 %v526_v9, %v510_v8  ;;  %v524_v15 = vld [vmem:[%s1723_s30 + $0x50] sm:$0xff]  ;;  %v582_v16 = vadd.f32 %v525_v12, %v509_v11  ;;  %v507_v17 = vld [vmem:[%s1717_s5 + $0x48] sm:$0xff]  ;;  %v506_v20 = vld [vmem:[%s1717_s5 + $0x40] sm:$0xff] }
  0x67   : > { %532 = vmatpush.msra.mxu0 %v511_v5  ;;  %v523_v18 = vld [vmem:[%s1723_s30 + $0x48] sm:$0xff]  ;;  %v581_v19 = vadd.f32 %v524_v15, %v508_v14  ;;  %v522_v21 = vld [vmem:[%s1723_s30 + $0x40] sm:$0xff]  ;;  %v505_v23 = vld [vmem:[%s1717_s5 + $0x38] sm:$0xff] }
  0x68   : > { %p490_p7 = scmp.lt.s32.totalorder %s1957_s19, 1  ;;  %588 = vmatpush.msra.mxu2 %v585_v7  ;;  %552 = vmatpush.msra.mxu1 %v527_v6  ;;  %v580_v22 = vadd.f32 %v523_v18, %v507_v17  ;;  %v521_v24 = vld [vmem:[%s1723_s30 + $0x38] sm:$0xff]  ;;  %v579_v25 = vadd.f32 %v522_v21, %v506_v20  ;;  %v504_v26 = vld [vmem:[%s1717_s5 + $0x30] sm:$0xff]  ;;  %v503_v29 = vld [vmem:[%s1717_s5 + $0x28] sm:$0xff] }
  0x69   : > { %533 = vmatpush.msra.mxu0 %v510_v8  ;;  %v520_v27 = vld [vmem:[%s1723_s30 + $0x30] sm:$0xff]  ;;  %v578_v28 = vadd.f32 %v521_v24, %v505_v23  ;;  %v519_v30 = vld [vmem:[%s1723_s30 + $0x28] sm:$0xff]  ;;  %v502_v32 = vld [vmem:[%s1717_s5 + $0x20] sm:$0xff] }
  0x6a   : > { %s2005_s19 = smov (!%p490_p7, %s1957_s19), 1  ;;  %589 = vmatpush.msra.mxu2 %v584_v10  ;;  %553 = vmatpush.msra.mxu1 %v526_v9  ;;  %v577_v31 = vadd.f32 %v520_v27, %v504_v26  ;;  %v518_v33 = vld [vmem:[%s1723_s30 + $0x20] sm:$0xff]  ;;  %v576_v34 = vadd.f32 %v519_v30, %v503_v29  ;;  %v501_v35 = vld [vmem:[%s1717_s5 + $0x18] sm:$0xff]  ;;  %v500_v38 = vld [vmem:[%s1717_s5 + $0x10] sm:$0xff] }
  0x6b   : > { %s492_s4 = scalar_lea.vmem %s1958_s21, %s2005_s19  ;;  %s495_s13 = scalar_lea.vmem %s1959_s18, %s2005_s19  ;;  %534 = vmatpush.msra.mxu0 %v509_v11  ;;  %v517_v36 = vld [vmem:[%s1723_s30 + $0x18] sm:$0xff]  ;;  %v575_v37 = vadd.f32 %v518_v33, %v502_v32  ;;  %v516_v39 = vld [vmem:[%s1723_s30 + $0x10] sm:$0xff]  ;;  %v499_v41 = vld [vmem:[%s1717_s5 + $0x8] sm:$0xff] }
  0x6c   : > { %590 = vmatpush.msra.mxu2 %v583_v13  ;;  %554 = vmatpush.msra.mxu1 %v525_v12  ;;  %v574_v40 = vadd.f32 %v517_v36, %v501_v35  ;;  %v515_v42 = vld [vmem:[%s1723_s30 + $0x8] sm:$0xff]  ;;  %v573_v43 = vadd.f32 %v516_v39, %v500_v38  ;;  %v498_v44 = vld [vmem:[%s1717_s5] sm:$0xff]  ;;  %v497_v48 = vld [vmem:[%s410_s26] sm:$0xff]  ;;  %p927_p13 = scmp.ne.s32.totalorder %s1960_s14, 0 }
  0x6d   : > { %535 = vmatpush.msra.mxu0 %v508_v14  ;;  %v514_v45 = vld [vmem:[%s1723_s30] sm:$0xff]  ;;  %v572_v46 = vadd.f32 %v515_v42, %v499_v41 }
  0x6e   : > { %591 = vmatpush.msra.mxu2 %v582_v16  ;;  %555 = vmatpush.msra.mxu1 %v524_v15  ;;  %v496_v47 = vld [vmem:[%s400_s11] sm:$0xff]  ;;  %v571_v49 = vadd.f32 %v514_v45, %v498_v44 }
  0x6f   : > { %536 = vmatpush.msra.mxu0 %v507_v17  ;;  %v570_v50 = vadd.f32 %v497_v48, %v496_v47 }
  0x70   : > { %592 = vmatpush.msra.mxu2 %v581_v19  ;;  %556 = vmatpush.msra.mxu1 %v523_v18 }
  0x71   : > { %537 = vmatpush.msra.mxu0 %v506_v20 }
  0x72   : > { %593 = vmatpush.msra.mxu2 %v580_v22  ;;  %557 = vmatpush.msra.mxu1 %v522_v21 }
  0x73   : > { %538 = vmatpush.msra.mxu0 %v505_v23 }
  0x74   : > { %594 = vmatpush.msra.mxu2 %v579_v25  ;;  %558 = vmatpush.msra.mxu1 %v521_v24 }
  0x75   : > { %539 = vmatpush.msra.mxu0 %v504_v26 }
  0x76   : > { %595 = vmatpush.msra.mxu2 %v578_v28  ;;  %559 = vmatpush.msra.mxu1 %v520_v27 }
  0x77   : > { %540 = vmatpush.msra.mxu0 %v503_v29 }
  0x78   : > { %596 = vmatpush.msra.mxu2 %v577_v31  ;;  %560 = vmatpush.msra.mxu1 %v519_v30 }
  0x79   : > { %541 = vmatpush.msra.mxu0 %v502_v32 }
  0x7a   : > { %597 = vmatpush.msra.mxu2 %v576_v34  ;;  %561 = vmatpush.msra.mxu1 %v518_v33 }
  0x7b   : > { %542 = vmatpush.msra.mxu0 %v501_v35 }
  0x7c   : > { %598 = vmatpush.msra.mxu2 %v575_v37  ;;  %562 = vmatpush.msra.mxu1 %v517_v36 }
  0x7d   : > { %543 = vmatpush.msra.mxu0 %v500_v38 }
  0x7e   : > { %599 = vmatpush.msra.mxu2 %v574_v40  ;;  %563 = vmatpush.msra.mxu1 %v516_v39 }
  0x7f   : > { %544 = vmatpush.msra.mxu0 %v499_v41 }
  0x80   : > { %600 = vmatpush.msra.mxu2 %v573_v43  ;;  %564 = vmatpush.msra.mxu1 %v515_v42 }
  0x81   : > { %545 = vmatpush.msra.mxu0 %v498_v44 }
  0x82   : > { %601 = vmatpush.msra.mxu2 %v572_v46  ;;  %565 = vmatpush.msra.mxu1 %v514_v45 }
  0x83   : > { %546 = vmatmul.f32.vlgmr.msra.gmra.mxu0 %v496_v47  ;;  %566 = vmatmul.f32.vlgmr.msra.gmra.mxu1 %v497_v48 }
  0x84   : > { %602 = vmatpush.msra.mxu2 %v571_v49 }
  0x85   : > { %603 = vmatmul.f32.vlgmr.msra.gmra.mxu2 %v570_v50 }
 0x100   : > { %v547_v51 = vpop.f32.mrf.mxu0  ;;  %v567_v52 = vpop.f32.mrf.mxu1 }
 0x104   : > { %610 = sbr.rel (%p927_p13) target bundleno = 268 (0x10c), region = 64 }
 0x108   : > { %v604_v53 = vpop.f32.mrf.mxu2 }
 0x109   : > { %611 = vst [vmem:[#allocation2] sm:$0xff] %v547_v51 }
 0x10a   : > { %612 = vst [vmem:[#allocation3] sm:$0xff] %v567_v52 }
 0x10b   : > { %613 = vst [vmem:[#allocation4] sm:$0xff] %v604_v53 }
 0x10c PF: > { %s1961_s16 = sld [smem:[#allocation24_spill]] }
 0x112   : > { %p928_p0 = scmp.eq.s32.totalorder %s1961_s16, 0 }
 0x114   : > { %617 = sbr.rel (%p928_p0) target bundleno = 287 (0x11f), region = 68 }
 0x119   : > { %v618_v54 = vld [vmem:[#allocation2] sm:$0xff]  ;;  %v621_v55 = vld [vmem:[#allocation3] sm:$0xff]  ;;  %v624_v56 = vld [vmem:[#allocation4] sm:$0xff] }
 0x11a   : > { %v619_v57 = vadd.f32 %v618_v54, %v547_v51  ;;  %v622_v58 = vadd.f32 %v621_v55, %v567_v52  ;;  %v625_v59 = vadd.f32 %v624_v56, %v604_v53 }
 0x11c   : > { %620 = vst [vmem:[#allocation2] sm:$0xff] %v619_v57 }
 0x11d   : > { %623 = vst [vmem:[#allocation3] sm:$0xff] %v622_v58 }
 0x11e   : > { %626 = vst [vmem:[#allocation4] sm:$0xff] %v625_v59 }
 0x11f PF: > { %s1962_s2 = sld [smem:[#allocation24_spill]] }
 0x125   : > { %p929_p2 = scmp.ne.s32.totalorder %s1962_s2, 2 }
 0x127   : > { %630 = sbr.rel (%p929_p2) target bundleno = 308 (0x134), region = 72 }
 0x12c   : > { %v631_v60 = vld [vmem:[#allocation2] sm:$0xff]  ;;  %v632_v61 = vld [vmem:[#allocation3] sm:$0xff]  ;;  %v634_v0 = vld [vmem:[#allocation4] sm:$0xff] }
 0x12d   : > { %v633_v62 = vsub.f32 %v631_v60, %v632_v61  ;;  %v1107_v63 = vld [vmem:[%s492_s4] ss:$0 sm:$0xff]  ;;  %v635_v1 = vsub.f32 %v634_v0, %v631_v60 }
 0x12e   : > { %v1108_v2 = vld [vmem:[%s495_s13] ss:$0 sm:$0xff] }
 0x12f   : > { %v641_v3 = vadd.f32 %v1107_v63, %v633_v62  ;;  %v636_v4 = vsub.f32 %v635_v1, %v632_v61 }
 0x131   : > { %647 = vst [vmem:[%s1783_s27] sm:$0xff] %v641_v3  ;;  %v646_v5 = vadd.f32 %v1108_v2, %v636_v4 }
 0x133   : > { %648 = vst [vmem:[%s1787_s1] sm:$0xff] %v646_v5 }
 0x134 PF: > { %s1965_s5 = sld [smem:[#allocation26_spill]]  ;;  %s669_s20 = sshll.u32 %s1783_s27, 4  ;;  %s670_s20 = int_to_ptr.vmem [resolvable:$true] %s669_s20 }
 0x135   : > { %s1966_s17 = sld [smem:[#allocation25_spill]]  ;;  %s685_s0 = sshll.u32 %s1787_s1, 4  ;;  %s686_s0 = int_to_ptr.vmem [resolvable:$true] %s685_s0 }
 0x136   : > { %s1968_s12 = sld [smem:[#allocation44_spill]]  ;;  %s650_s15 = scalar_lea.sflag [#allocation7], %s1730_s23 }
 0x137   : > { %s1970_s2 = sld [smem:[#allocation45_spill]] }
 0x13a   : > { %s932_s10 = sshll.u32 %s1965_s5, 1 }
 0x13b   : > { %s665_s6 = sadd.s32 %s1966_s17, %s932_s10 }
 0x13c   : > { %s933_s21 = sshll.u32 %s665_s6, 3  ;;  %s1969_s7 = smov %s1968_s12 }
 0x13d   : > { %s667_s18 = scalar_lea.hbm %s1968_s12, %s933_s21  ;;  %s683_s11 = scalar_lea.hbm %s1970_s2, %s933_s21 }
 0x13e   : > { %s671_s13 = sshll.u32 %s667_s18, 4  ;;  %s1249_s5 = scalar_lea.hbm %s1969_s7, 32  ;;  %s672_s13 = int_to_ptr.hbm [resolvable:$true] %s671_s13 }
 0x13f   : > { %s1243_s26 = sshra.s32 %s672_s13, 4  ;;  %s1244_s26 = int_to_ptr.hbm [resolvable:$true] %s1243_s26 }
 0x140   : > { %s1245_s24 = scalar_lea.hbm %s1244_s26, 8  ;;  %p1250_p11 = scmp.lt.s32.totalorder %s1244_s26, %s1969_s7 }
 0x141   : > { %p1246_p6 = scmp.ne.s32.totalorder %s1244_s26, %s1245_s24  ;;  %p1251_p5 = scmp.lt.s32.totalorder %s1249_s5, %s1245_s24 }
 0x143   : > { %p1247_p8 = pnand %p1246_p6, %p1627_p4  ;;  %p1252_p12 = por %p1251_p5, %p1250_p11 }
 0x145   : > { %p1248_p9 = pneg %p1247_p8 }
 0x147   : > { %p1253_p1 = pnand %p1252_p12, %p1248_p9 }
 0x149   : > { %1256 = shalt.err (!%p1253_p1)
}
 0x14a   : > { %950 = dma.vmem_to_hbm [thread:$0]  (%p1627_p4), %s670_s20, 128, %s672_s13, %s650_s15  }
 0x14b   : > { %s687_s1 = sshll.u32 %s683_s11, 4  ;;  %s655_s6 = scalar_lea.sflag [#allocation15], %s1730_s23  ;;  %s688_s1 = int_to_ptr.hbm [resolvable:$true] %s687_s1 }
 0x14c   : > { %s1271_s21 = sshra.s32 %s688_s1, 4  ;;  %s1277_s18 = scalar_lea.hbm %s1970_s2, 32  ;;  %s1272_s21 = int_to_ptr.hbm [resolvable:$true] %s1271_s21 }
 0x14d   : > { %s1273_s4 = scalar_lea.hbm %s1272_s21, 8  ;;  %p1278_p0 = scmp.lt.s32.totalorder %s1272_s21, %s1970_s2 }
 0x14e   : > { %p1274_p3 = scmp.ne.s32.totalorder %s1272_s21, %s1273_s4  ;;  %p1279_p2 = scmp.lt.s32.totalorder %s1277_s18, %s1273_s4 }
 0x150   : > { %p1275_p7 = pnand %p1274_p3, %p1627_p4  ;;  %p1280_p6 = por %p1279_p2, %p1278_p0 }
 0x152   : > { %p1276_p13 = pneg %p1275_p7 }
 0x154   : > { %p1281_p8 = pnand %p1280_p6, %p1276_p13 }
 0x156   : > { %1284 = shalt.err (!%p1281_p8)
}
 0x157   : > { %951 = dma.vmem_to_hbm [thread:$0]  (%p1627_p4), %s686_s0, 128, %s688_s1, %s655_s6  }
 0x158 PF: > { %s1971_s23 = sld [smem:[#allocation30_spill]] }
 0x159   : > { %s1972_s20 = sld [smem:[#allocation22_spill]] }
 0x15e   : > { %p975_p9 = scmp.ge.s32.totalorder %s1971_s23, 2 }
 0x15f   : > { %s699_s11 = sand.u32 1, %s1972_s20  }
 0x160   : > { %p968_p11 = pnand %p975_p9, %p1637_p10  ;;  %s700_s15 = scalar_lea.sflag [#allocation7], %s699_s11 }
 0x162   : > { %p969_p5 = pneg %p968_p11 }
 0x164   : > { %1366 = dma.done.wait (%p969_p5), %s700_s15, 128  }
 0x165   : > { %1368 = vsyncadd (%p969_p5), %s700_s15, 4294967168  ;;  %s710_s26 = scalar_lea.sflag [#allocation15], %s699_s11 }
 0x166   : > { %1370 = dma.done.wait (%p969_p5), %s710_s26, 128  }
 0x167   : > { %1372 = vsyncadd (%p969_p5), %s710_s26, 4294967168  ;;  %s33_s16 = sadd.s32 1, %s1971_s23   ;;  %s1975_s0 = sld [smem:[#allocation23_spill]] }
 0x168   : > { %p1841_p12 = scmp.ge.s32.totalorder %s33_s16, 14   ;;  %s1976_s26 = sld [smem:[#allocation36_spill]] }
 0x169   : > { %s1977_s22 = sld [smem:[#allocation34_spill]]  ;;  %s1985_s24 = smov %s1379_s25 }
 0x16a   : > { %s1978_s5 = sld [smem:[#allocation35_spill]]  ;;  %s1988_s27 = smov %s1391_s28 }
 0x16b   : > { %s1979_s10 = sld [smem:[#allocation27_spill]]  ;;  %s1989_s28 = smov %s1395_s29 }
 0x16c   : > { %s1980_s11 = sld [smem:[#allocation28_spill]]  ;;  %s1991_s30 = smov %s1403_s8 }
 0x16d   : > { %s1981_s12 = sld [smem:[#allocation29_spill]]  ;;  %s1987_s25 = smov %s1975_s0 }
 0x16e   : > { %s1982_s13 = sld [smem:[#allocation31_spill]]  ;;  %s1992_s8 = smov %s1407_s9 }
 0x16f   : > { %s1983_s14 = sld [smem:[#allocation32_spill]]  ;;  %s1990_s29 = smov %s1977_s22 }
 0x170   : > { %s1984_s15 = sld [smem:[#allocation33_spill]]  ;;  %s1993_s9 = smov %s1978_s5 }
 0x171   :  { %32 = sbr.rel (!%p1841_p12) target bundleno = 25 (0x19), region = 161 }
 0x176   :  { %716 = vsyncpa [#allocation6], 1 }
 0x177   :  { %718 = vsyncpa [#allocation6 + $0x1], 1 }
 0x178   :  { %719 = vsyncpa [#allocation9], 1 }
 0x179   :  { %721 = vsyncpa [#allocation9 + $0x1], 1 }
 0x17a   :  { %722 = vsyncpa [#allocation12], 1 }
 0x17b   :  { %724 = vsyncpa [#allocation12 + $0x1], 1 }
 0x17c   :  { %725 = vsyncpa [#allocation7], 1 }
 0x17d   :  { %727 = vsyncpa [#allocation7 + $0x1], 1 }
 0x17e   :  { %728 = vsyncpa [#allocation15], 1 }
 0x17f   :  { %730 = vsyncpa [#allocation15 + $0x1], 1 }

</bundles_post_ra>
